<compile_context>
chip_gen: v5e
topology: v5e:2x2
jax: 0.10.0
libtpu: 0.0.40
codegen_flags: <defaults>
</compile_context>

<pallas_src>
import functools

import jax
import jax.numpy as jnp
from jax import lax
from jax.experimental import pallas as pl
from jax.experimental.pallas import tpu as pltpu


_VMEM_LIMIT = 48 * 1024 * 1024  # above the 16/32 MiB default scoped caps, below v7x physical


def _round_up(x, m):
    return (x + m - 1) // m * m


# ---------------------------------------------------------------------------
# Kernel 1: Q/K/V projections (computed once; Q pre-scaled by 1/sqrt(d_out)).
# ---------------------------------------------------------------------------
def _qkv_proj_kernel(x_ref, wq_ref, wk_ref, wv_ref, q_ref, k_ref, v_ref, *, scale):
    x = x_ref[...]  # native dtype MXU operands, f32 accumulation
    q = jnp.dot(x, wq_ref[...], preferred_element_type=jnp.float32)
    k = jnp.dot(x, wk_ref[...], preferred_element_type=jnp.float32)
    v = jnp.dot(x, wv_ref[...], preferred_element_type=jnp.float32)
    q_ref[...] = (q * scale).astype(q_ref.dtype)
    k_ref[...] = k.astype(k_ref.dtype)
    v_ref[...] = v.astype(v_ref.dtype)


# ---------------------------------------------------------------------------
# Kernel 2: flash-attention forward with online softmax.
# ---------------------------------------------------------------------------
def _flash_attn_kernel(q_ref, k_ref, v_ref, o_ref, m_sc, l_sc, acc_sc, *, kv_valid, tkv):
    kv = pl.program_id(1)

    @pl.when(kv == 0)
    def _():
        m_sc[...] = jnp.full_like(m_sc, -jnp.inf)
        l_sc[...] = jnp.zeros_like(l_sc)
        acc_sc[...] = jnp.zeros_like(acc_sc)

    # scores = q @ k^T without materializing the transpose (contract last dims).
    s = lax.dot_general(
        q_ref[...], k_ref[...],
        (((1,), (1,)), ((), ())),
        preferred_element_type=jnp.float32,
    )  # (TQ, TKV), f32

    if kv_valid is not None:  # static: seq was padded -> mask padded kv columns
        col = kv * tkv + lax.broadcasted_iota(jnp.int32, s.shape, 1)
        s = jnp.where(col < kv_valid, s, -jnp.inf)

    m_prev = m_sc[...]
    m_new = jnp.maximum(m_prev, jnp.max(s, axis=-1, keepdims=True))
    a = jnp.exp(m_prev - m_new)
    p = jnp.exp(s - m_new)

    l_sc[...] = a * l_sc[...] + jnp.sum(p, axis=-1, keepdims=True)
    acc_sc[...] = a * acc_sc[...] + jnp.dot(
        p.astype(v_ref.dtype), v_ref[...], preferred_element_type=jnp.float32
    )
    m_sc[...] = m_new

    @pl.when(kv == pl.num_programs(1) - 1)
    def _():
        inv_l = pl.reciprocal(l_sc[...], approx=True)  # EUP slot, ~free
        o_ref[...] = (acc_sc[...] * inv_l).astype(o_ref.dtype)


# ---------------------------------------------------------------------------
# Wrapper
# ---------------------------------------------------------------------------
def self_attention_v2(x, w_query, w_key, w_value):
    """x: (seq, d_in); w_*: (d_out, d_in) in PyTorch nn.Linear convention (no bias)."""
    seq, d_in = x.shape
    d_out = w_query.shape[0]
    scale = 1.0 / (float(d_out) ** 0.5)
    dtype = x.dtype

    # Seq tile size: 128-granular, capped at 512 so tiles also fit v7x's 64 MiB VMEM.
    if seq >= 512:
        tq = tkv = 512
    elif seq >= 256:
        tq = tkv = 256
    else:
        tq = tkv = 128

    seq_p = _round_up(seq, tq)          # tq == tkv, so it divides both grid axes
    d_in_p = _round_up(d_in, 128)       # lane-dense contraction dim
    d_out_p = _round_up(d_out, 128)     # lane-dense output / head dim

    # Zero-pad operands (zeros are neutral for the projections; padded kv
    # positions are masked inside the attention kernel).
    x_p = jnp.pad(x, ((0, seq_p - seq), (0, d_in_p - d_in)))
    pad_w = lambda w: jnp.pad(w.T, ((0, d_in_p - d_in), (0, d_out_p - d_out)))
    wq_t, wk_t, wv_t = pad_w(w_query), pad_w(w_key), pad_w(w_value)

    # ---- 1) Q/K/V projections, tiled over seq rows (done once). ----
    q, k, v = pl.pallas_call(
        functools.partial(_qkv_proj_kernel, scale=scale),
        out_shape=[jax.ShapeDtypeStruct((seq_p, d_out_p), dtype)] * 3,
        grid=(seq_p // tq,),
        in_specs=[
            pl.BlockSpec((tq, d_in_p), lambda i: (i, 0)),
            pl.BlockSpec((d_in_p, d_out_p), lambda i: (0, 0)),
            pl.BlockSpec((d_in_p, d_out_p), lambda i: (0, 0)),
            pl.BlockSpec((d_in_p, d_out_p), lambda i: (0, 0)),
        ],
        out_specs=[pl.BlockSpec((tq, d_out_p), lambda i: (i, 0))] * 3,
        compiler_params=pltpu.CompilerParams(
            dimension_semantics=("parallel",),
            vmem_limit_bytes=_VMEM_LIMIT,
        ),
    )(x_p, wq_t, wk_t, wv_t)

    # ---- 2) Flash attention over (q_tiles, kv_tiles). ----
    kv_valid = seq if seq_p != seq else None

    out = pl.pallas_call(
        functools.partial(_flash_attn_kernel, kv_valid=kv_valid, tkv=tkv),
        out_shape=jax.ShapeDtypeStruct((seq_p, d_out_p), dtype),
        grid=(seq_p // tq, seq_p // tkv),
        in_specs=[
            pl.BlockSpec((tq, d_out_p), lambda i, j: (i, 0)),    # Q tile
            pl.BlockSpec((tkv, d_out_p), lambda i, j: (j, 0)),   # K tile
            pl.BlockSpec((tkv, d_out_p), lambda i, j: (j, 0)),   # V tile
        ],
        out_specs=pl.BlockSpec((tq, d_out_p), lambda i, j: (i, 0)),
        scratch_shapes=[
            pltpu.VMEM((tq, 1), jnp.float32),        # running max m
            pltpu.VMEM((tq, 1), jnp.float32),        # running denom l
            pltpu.VMEM((tq, d_out_p), jnp.float32),  # f32 accumulator
        ],
        compiler_params=pltpu.CompilerParams(
            dimension_semantics=("parallel", "arbitrary"),
            vmem_limit_bytes=_VMEM_LIMIT,
        ),
    )(q, k, v)

    return out[:seq, :d_out]


# ---------------------------------------------------------------------------
# Reference + test
# ---------------------------------------------------------------------------
def _reference(x, w_query, w_key, w_value):
    q = x @ w_query.T
    k = x @ w_key.T
    v = x @ w_value.T
    scores = q @ k.T
    w = jax.nn.softmax(scores / (k.shape[-1] ** 0.5), axis=-1)
    return w @ v


def _check(seq, d_in, d_out, key):
    kx, kq, kk, kv = jax.random.split(key, 4)
    x = jax.random.normal(kx, (seq, d_in), dtype=jnp.float32)
    w_query = jax.random.normal(kq, (d_out, d_in), dtype=jnp.float32) * 0.1
    w_key = jax.random.normal(kk, (d_out, d_in), dtype=jnp.float32) * 0.1
    w_value = jax.random.normal(kv, (d_out, d_in), dtype=jnp.float32) * 0.1

    out = jax.block_until_ready(self_attention_v2(x, w_query, w_key, w_value))
    ref = _reference(x, w_query, w_key, w_value)

    assert out.shape == (seq, d_out)
    # Tolerance accounts for the approx (EUP) reciprocal in the softmax denom.
    assert jnp.allclose(out, ref, atol=1e-3, rtol=1e-3), (
        f"mismatch at seq={seq}: max abs err {jnp.max(jnp.abs(out - ref))}"
    )


if __name__ == "__main__":
    key = jax.random.PRNGKey(0)
    k1, k2 = jax.random.split(key)

    # Small shape matching the module's intended use (2-D, unbatched input).
    _check(seq=8, d_in=32, d_out=16, key=k1)
    # Non-aligned, multi-tile shape: exercises the (q, kv) grid, online-softmax
    # accumulation across kv tiles, and padded-kv masking.
    _check(seq=300, d_in=64, d_out=32, key=k2)

    print("KERNEL_OK")
</pallas_src>

<mosaic_0001>
module attributes {stable_mosaic.version = 11 : i64} {
  func.func @_qkv_proj_kernel(%arg0: i32, %arg1: memref<128x128xf32, #tpu.memory_space<vmem>>, %arg2: memref<128x128xf32, #tpu.memory_space<vmem>>, %arg3: memref<128x128xf32, #tpu.memory_space<vmem>>, %arg4: memref<128x128xf32, #tpu.memory_space<vmem>>, %arg5: memref<128x128xf32, #tpu.memory_space<vmem>>, %arg6: memref<128x128xf32, #tpu.memory_space<vmem>>, %arg7: memref<128x128xf32, #tpu.memory_space<vmem>>) attributes {dimension_semantics = [#tpu.dimension_semantics<parallel>], iteration_bounds = array<i64: 1>, scalar_prefetch = 0 : i64, scratch_operands = 0 : i64, tpu.core_type = #tpu.core_type<tc>, window_params = [{transform_indices = @transform_0, window_bounds = array<i64: 128, 128>}, {pipeline_mode = #tpu.pipeline_mode<synchronous>, transform_indices = @transform_1, window_bounds = array<i64: 128, 128>}, {pipeline_mode = #tpu.pipeline_mode<synchronous>, transform_indices = @transform_2, window_bounds = array<i64: 128, 128>}, {pipeline_mode = #tpu.pipeline_mode<synchronous>, transform_indices = @transform_3, window_bounds = array<i64: 128, 128>}, {transform_indices = @transform_4, window_bounds = array<i64: 128, 128>}, {transform_indices = @transform_5, window_bounds = array<i64: 128, 128>}, {transform_indices = @transform_6, window_bounds = array<i64: 128, 128>}]} {
    %c0 = arith.constant 0 : index
    %c0_0 = arith.constant 0 : index
    %0 = vector.load %arg1[%c0, %c0_0] : memref<128x128xf32, #tpu.memory_space<vmem>>, vector<128x128xf32>
    %c0_1 = arith.constant 0 : index
    %c0_2 = arith.constant 0 : index
    %1 = vector.load %arg2[%c0_1, %c0_2] : memref<128x128xf32, #tpu.memory_space<vmem>>, vector<128x128xf32>
    %cst = arith.constant dense<0.000000e+00> : vector<128x128xf32>
    %2 = tpu.matmul %0, %1, %cst {dimension_numbers = #tpu.dot_dimension_numbers<[1], [0], [0], [1], [0, 0, 1, 1], [], []>} : vector<128x128xf32>, vector<128x128xf32>, vector<128x128xf32> -> vector<128x128xf32>
    %c0_3 = arith.constant 0 : index
    %c0_4 = arith.constant 0 : index
    %3 = vector.load %arg3[%c0_3, %c0_4] : memref<128x128xf32, #tpu.memory_space<vmem>>, vector<128x128xf32>
    %cst_5 = arith.constant dense<0.000000e+00> : vector<128x128xf32>
    %4 = tpu.matmul %0, %3, %cst_5 {dimension_numbers = #tpu.dot_dimension_numbers<[1], [0], [0], [1], [0, 0, 1, 1], [], []>} : vector<128x128xf32>, vector<128x128xf32>, vector<128x128xf32> -> vector<128x128xf32>
    %c0_6 = arith.constant 0 : index
    %c0_7 = arith.constant 0 : index
    %5 = vector.load %arg4[%c0_6, %c0_7] : memref<128x128xf32, #tpu.memory_space<vmem>>, vector<128x128xf32>
    %cst_8 = arith.constant dense<0.000000e+00> : vector<128x128xf32>
    %6 = tpu.matmul %0, %5, %cst_8 {dimension_numbers = #tpu.dot_dimension_numbers<[1], [0], [0], [1], [0, 0, 1, 1], [], []>} : vector<128x128xf32>, vector<128x128xf32>, vector<128x128xf32> -> vector<128x128xf32>
    %cst_9 = arith.constant 2.500000e-01 : f32
    %7 = vector.broadcast %cst_9 : f32 to vector<128x128xf32>
    %8 = arith.mulf %2, %7 : vector<128x128xf32>
    %c0_10 = arith.constant 0 : index
    %c0_11 = arith.constant 0 : index
    %9 = vector.load %arg5[%c0_10, %c0_11] : memref<128x128xf32, #tpu.memory_space<vmem>>, vector<128x128xf32>
    tpu.vector_store %arg5[%c0_10, %c0_11], %8 {strides = array<i32>} : memref<128x128xf32, #tpu.memory_space<vmem>>, vector<128x128xf32>,
    %c0_12 = arith.constant 0 : index
    %c0_13 = arith.constant 0 : index
    %10 = vector.load %arg6[%c0_12, %c0_13] : memref<128x128xf32, #tpu.memory_space<vmem>>, vector<128x128xf32>
    tpu.vector_store %arg6[%c0_12, %c0_13], %4 {strides = array<i32>} : memref<128x128xf32, #tpu.memory_space<vmem>>, vector<128x128xf32>,
    %c0_14 = arith.constant 0 : index
    %c0_15 = arith.constant 0 : index
    %11 = vector.load %arg7[%c0_14, %c0_15] : memref<128x128xf32, #tpu.memory_space<vmem>>, vector<128x128xf32>
    tpu.vector_store %arg7[%c0_14, %c0_15], %6 {strides = array<i32>} : memref<128x128xf32, #tpu.memory_space<vmem>>, vector<128x128xf32>,
    return
  }
  func.func @transform_0(%arg0: i32) -> (i32, i32) {
    %c0_i32 = arith.constant 0 : i32
    %c0_i32_0 = arith.constant 0 : i32
    return %arg0, %c0_i32 : i32, i32
  }
  func.func @transform_1(%arg0: i32) -> (i32, i32) {
    %c0_i32 = arith.constant 0 : i32
    %c0_i32_0 = arith.constant 0 : i32
    %c0_i32_1 = arith.constant 0 : i32
    return %c0_i32, %c0_i32_0 : i32, i32
  }
  func.func @transform_2(%arg0: i32) -> (i32, i32) {
    %c0_i32 = arith.constant 0 : i32
    %c0_i32_0 = arith.constant 0 : i32
    %c0_i32_1 = arith.constant 0 : i32
    return %c0_i32, %c0_i32_0 : i32, i32
  }
  func.func @transform_3(%arg0: i32) -> (i32, i32) {
    %c0_i32 = arith.constant 0 : i32
    %c0_i32_0 = arith.constant 0 : i32
    %c0_i32_1 = arith.constant 0 : i32
    return %c0_i32, %c0_i32_0 : i32, i32
  }
  func.func @transform_4(%arg0: i32) -> (i32, i32) {
    %c0_i32 = arith.constant 0 : i32
    %c0_i32_0 = arith.constant 0 : i32
    return %arg0, %c0_i32 : i32, i32
  }
  func.func @transform_5(%arg0: i32) -> (i32, i32) {
    %c0_i32 = arith.constant 0 : i32
    %c0_i32_0 = arith.constant 0 : i32
    return %arg0, %c0_i32 : i32, i32
  }
  func.func @transform_6(%arg0: i32) -> (i32, i32) {
    %c0_i32 = arith.constant 0 : i32
    %c0_i32_0 = arith.constant 0 : i32
    return %arg0, %c0_i32 : i32, i32
  }
}

</mosaic_0001>

<bundles_post_ra>
// kernel: tpu_custom_call.1
= control target key start
LH: loop header
LB: loop body
LE: loop exit
PB: predicated region body
PF: predicated region fallthrough
CT: control target
= control target key end

     0   :  { %12 = vsyncpa [#allocation3], 0  ;;  %s913_s0 = inlined_call_operand.hbm [shape: f32[128,128], index: 0, kind: input, shape index: {}]   ;;  %s914_s1 = inlined_call_operand.hbm [shape: f32[128,128], index: 1, kind: input, shape index: {}]   ;;  %s915_s2 = inlined_call_operand.hbm [shape: f32[128,128], index: 2, kind: input, shape index: {}]   ;;  %s916_s3 = inlined_call_operand.hbm [shape: f32[128,128], index: 3, kind: input, shape index: {}]   ;;  %s917_s4 = inlined_call_operand.hbm [shape: f32[128,128], index: 4, kind: output, shape index: {0}]   ;;  %s918_s5 = inlined_call_operand.hbm [shape: f32[128,128], index: 5, kind: output, shape index: {1}]   ;;  %s919_s6 = inlined_call_operand.hbm [shape: f32[128,128], index: 6, kind: output, shape index: {2}]  }
   0x1   :  { %13 = vsyncpa [#allocation6], 0 }
   0x2   :  { %14 = vsyncpa [#allocation9], 0 }
   0x3   :  { %15 = vsyncpa [#allocation4], 0 }
   0x4   :  { %16 = vsyncpa [#allocation12], 0  ;;  %s34_s23 = sshll.u32 %s914_s1, 4  ;;  %s699_s24 = smov [#allocation5]   ;;  %s35_s23 = int_to_ptr.hbm [resolvable:$true] %s34_s23 }
   0x5   :  { %s36_s25 = sshll.u32 %s699_s24, 4  ;;  %s21_s28 = sshll.u32 %s913_s0, 4  ;;  %s37_s25 = int_to_ptr.vmem [resolvable:$true] %s36_s25  ;;  %s22_s28 = int_to_ptr.hbm [resolvable:$true] %s21_s28 }
   0x6   :  { %s700_s29 = smov 128   ;;  %s701_s30 = smov 8  }
   0x7   :  { %42 = dma.hbm_to_vmem [thread:$0]  %s35_s23, 2048, %s37_s25, [#allocation6], %s700_s29, %s700_s29, %s701_s30  }
   0x8   :  { %s702_s7 = smov [#allocation2]   ;;  %s47_s1 = sshll.u32 %s915_s2, 4  ;;  %s48_s1 = int_to_ptr.hbm [resolvable:$true] %s47_s1 }
   0x9   :  { %s23_s8 = sshll.u32 %s702_s7, 4  ;;  %s60_s12 = sshll.u32 %s916_s3, 4  ;;  %s24_s8 = int_to_ptr.vmem [resolvable:$true] %s23_s8  ;;  %s61_s12 = int_to_ptr.hbm [resolvable:$true] %s60_s12 }
   0xa   :  { %29 = dma.hbm_to_vmem [thread:$0]  %s22_s28, 2048, %s24_s8, [#allocation3], %s700_s29, %s700_s29, %s701_s30  }
   0xb   :  { %s703_s13 = smov [#allocation7]   ;;  %s704_s15 = smov [#allocation8]  }
   0xc   :  { %s49_s14 = sshll.u32 %s703_s13, 4  ;;  %s62_s2 = sshll.u32 %s704_s15, 4  ;;  %s50_s14 = int_to_ptr.vmem [resolvable:$true] %s49_s14  ;;  %s63_s2 = int_to_ptr.vmem [resolvable:$true] %s62_s2 }
   0xd   :  { %55 = dma.hbm_to_vmem [thread:$0]  %s48_s1, 2048, %s50_s14, [#allocation6], %s700_s29, %s700_s29, %s701_s30  }
   0xe   :  { %68 = dma.hbm_to_vmem [thread:$0]  %s61_s12, 2048, %s63_s2, [#allocation9], %s700_s29, %s700_s29, %s701_s30  }
   0xf   :  { %689 = dma.done.wait [#allocation3], 2048  }
  0x10   :  { %690 = vsyncadd [#allocation3], 4294965248 }
  0x11   :  { %691 = dma.done.wait [#allocation6], 4096  }
  0x12   :  { %692 = vsyncadd [#allocation6], 4294963200 }
  0x13   :  { %693 = dma.done.wait [#allocation9], 2048  }
  0x14   :  { %694 = vsyncadd [#allocation9], 4294965248  ;;  %v116_v0 = vld [vmem:[#allocation5 + $0x78] sm:$0xff]  ;;  %v115_v2 = vld [vmem:[#allocation5 + $0x70] sm:$0xff]  ;;  %s705_s3 = smov [#allocation10]   ;;  %s414_s19 = sshll.u32 %s917_s4, 4  ;;  %s415_s19 = int_to_ptr.hbm [resolvable:$true] %s414_s19 }
  0x15   :  { %v767_v1 = vld [vmem:[#allocation8 + $0x78] sm:$0xff]  ;;  %464 = vmatpush.msra.mxu3 %v116_v0  ;;  %v770_v3 = vld [vmem:[#allocation8 + $0x70] sm:$0xff]  ;;  %117 = vmatpush.msra.mxu0 %v116_v0  ;;  %v114_v4 = vld [vmem:[#allocation5 + $0x68] sm:$0xff]  ;;  %s412_s16 = sshll.u32 %s705_s3, 4  ;;  %s706_s20 = smov [#allocation11]   ;;  %s413_s16 = int_to_ptr.vmem [resolvable:$true] %s412_s16 }
  0x16   :  { %279 = vmatpush.msra.mxu2 %v767_v1  ;;  %v772_v5 = vld [vmem:[#allocation8 + $0x68] sm:$0xff]  ;;  %v774_v6 = vld [vmem:[#allocation7 + $0x78] sm:$0xff]  ;;  %v777_v7 = vld [vmem:[#allocation7 + $0x70] sm:$0xff]  ;;  %s425_s21 = sshll.u32 %s706_s20, 4  ;;  %s427_s24 = sshll.u32 %s918_s5, 4  ;;  %s426_s21 = int_to_ptr.vmem [resolvable:$true] %s425_s21  ;;  %s428_s24 = int_to_ptr.hbm [resolvable:$true] %s427_s24 }
  0x17   :  { %465 = vmatpush.msra.mxu3 %v115_v2  ;;  %198 = vmatpush.msra.mxu1 %v774_v6  ;;  %v113_v8 = vld [vmem:[#allocation5 + $0x60] sm:$0xff]  ;;  %v783_v10 = vld [vmem:[#allocation7 + $0x68] sm:$0xff]  ;;  %v112_v11 = vld [vmem:[#allocation5 + $0x58] sm:$0xff]  ;;  %s707_s25 = smov [#allocation13]   ;;  %s440_s7 = sshll.u32 %s919_s6, 4  ;;  %s441_s7 = int_to_ptr.hbm [resolvable:$true] %s440_s7 }
  0x18   :  { %280 = vmatpush.msra.mxu2 %v770_v3  ;;  %118 = vmatpush.msra.mxu0 %v115_v2  ;;  %v780_v9 = vld [vmem:[#allocation8 + $0x60] sm:$0xff]  ;;  %v786_v12 = vld [vmem:[#allocation8 + $0x58] sm:$0xff]  ;;  %v111_v14 = vld [vmem:[#allocation5 + $0x50] sm:$0xff]  ;;  %s438_s26 = sshll.u32 %s707_s25, 4  ;;  %s439_s26 = int_to_ptr.vmem [resolvable:$true] %s438_s26 }
  0x19   :  { %466 = vmatpush.msra.mxu3 %v114_v4  ;;  %199 = vmatpush.msra.mxu1 %v777_v7  ;;  %v789_v13 = vld [vmem:[#allocation7 + $0x60] sm:$0xff]  ;;  %v792_v15 = vld [vmem:[#allocation8 + $0x50] sm:$0xff]  ;;  %v795_v16 = vld [vmem:[#allocation7 + $0x58] sm:$0xff] }
  0x1a   :  { %281 = vmatpush.msra.mxu2 %v772_v5  ;;  %119 = vmatpush.msra.mxu0 %v114_v4  ;;  %v110_v17 = vld [vmem:[#allocation5 + $0x48] sm:$0xff]  ;;  %v801_v19 = vld [vmem:[#allocation7 + $0x50] sm:$0xff]  ;;  %v109_v20 = vld [vmem:[#allocation5 + $0x40] sm:$0xff] }
  0x1b   :  { %467 = vmatpush.msra.mxu3 %v113_v8  ;;  %200 = vmatpush.msra.mxu1 %v783_v10  ;;  %v798_v18 = vld [vmem:[#allocation8 + $0x48] sm:$0xff]  ;;  %v804_v21 = vld [vmem:[#allocation8 + $0x40] sm:$0xff]  ;;  %v108_v23 = vld [vmem:[#allocation5 + $0x38] sm:$0xff] }
  0x1c   :  { %282 = vmatpush.msra.mxu2 %v780_v9  ;;  %120 = vmatpush.msra.mxu0 %v113_v8  ;;  %v807_v22 = vld [vmem:[#allocation7 + $0x48] sm:$0xff]  ;;  %v810_v24 = vld [vmem:[#allocation8 + $0x38] sm:$0xff]  ;;  %v813_v25 = vld [vmem:[#allocation7 + $0x40] sm:$0xff] }
  0x1d   :  { %468 = vmatpush.msra.mxu3 %v112_v11  ;;  %201 = vmatpush.msra.mxu1 %v789_v13  ;;  %v107_v26 = vld [vmem:[#allocation5 + $0x30] sm:$0xff]  ;;  %v819_v28 = vld [vmem:[#allocation7 + $0x38] sm:$0xff]  ;;  %v106_v29 = vld [vmem:[#allocation5 + $0x28] sm:$0xff] }
  0x1e   :  { %283 = vmatpush.msra.mxu2 %v786_v12  ;;  %121 = vmatpush.msra.mxu0 %v112_v11  ;;  %v816_v27 = vld [vmem:[#allocation8 + $0x30] sm:$0xff]  ;;  %v822_v30 = vld [vmem:[#allocation8 + $0x28] sm:$0xff]  ;;  %v105_v32 = vld [vmem:[#allocation5 + $0x20] sm:$0xff] }
  0x1f   :  { %469 = vmatpush.msra.mxu3 %v111_v14  ;;  %202 = vmatpush.msra.mxu1 %v795_v16  ;;  %v825_v31 = vld [vmem:[#allocation7 + $0x30] sm:$0xff]  ;;  %v828_v33 = vld [vmem:[#allocation8 + $0x20] sm:$0xff]  ;;  %v831_v34 = vld [vmem:[#allocation7 + $0x28] sm:$0xff] }
  0x20   :  { %284 = vmatpush.msra.mxu2 %v792_v15  ;;  %122 = vmatpush.msra.mxu0 %v111_v14  ;;  %v104_v35 = vld [vmem:[#allocation5 + $0x18] sm:$0xff]  ;;  %v186_v37 = vld [vmem:[#allocation7 + $0x20] sm:$0xff]  ;;  %v103_v38 = vld [vmem:[#allocation5 + $0x10] sm:$0xff] }
  0x21   :  { %470 = vmatpush.msra.mxu3 %v110_v17  ;;  %203 = vmatpush.msra.mxu1 %v801_v19  ;;  %v834_v36 = vld [vmem:[#allocation8 + $0x18] sm:$0xff]  ;;  %v838_v39 = vld [vmem:[#allocation8 + $0x10] sm:$0xff]  ;;  %v102_v41 = vld [vmem:[#allocation5 + $0x8] sm:$0xff] }
  0x22   :  { %285 = vmatpush.msra.mxu2 %v798_v18  ;;  %123 = vmatpush.msra.mxu0 %v110_v17  ;;  %v185_v40 = vld [vmem:[#allocation7 + $0x18] sm:$0xff]  ;;  %v841_v42 = vld [vmem:[#allocation8 + $0x8] sm:$0xff]  ;;  %v184_v43 = vld [vmem:[#allocation7 + $0x10] sm:$0xff] }
  0x23   :  { %471 = vmatpush.msra.mxu3 %v109_v20  ;;  %204 = vmatpush.msra.mxu1 %v807_v22  ;;  %v101_v44 = vld [vmem:[#allocation5] sm:$0xff]  ;;  %v183_v48 = vld [vmem:[#allocation7 + $0x8] sm:$0xff]  ;;  %v861_v52 = vld [vmem:[#allocation2 + $0x70] sm:$0xff] }
  0x24   :  { %286 = vmatpush.msra.mxu2 %v804_v21  ;;  %124 = vmatpush.msra.mxu0 %v109_v20  ;;  %v844_v45 = vld [vmem:[#allocation8] sm:$0xff]  ;;  %v854_v50 = vld [vmem:[#allocation2 + $0x68] sm:$0xff]  ;;  %v87_v53 = vld [vmem:[#allocation2 + $0x10] sm:$0xff] }
  0x25   :  { %472 = vmatpush.msra.mxu3 %v108_v23  ;;  %205 = vmatpush.msra.mxu1 %v813_v25  ;;  %v847_v46 = vld [vmem:[#allocation2 + $0x60] sm:$0xff]  ;;  %v86_v51 = vld [vmem:[#allocation2 + $0x8] sm:$0xff]  ;;  %v868_v54 = vld [vmem:[#allocation2 + $0x78] sm:$0xff] }
  0x26   :  { %287 = vmatpush.msra.mxu2 %v810_v24  ;;  %125 = vmatpush.msra.mxu0 %v108_v23  ;;  %v85_v47 = vld [vmem:[#allocation2] sm:$0xff]  ;;  %v88_v55 = vld [vmem:[#allocation2 + $0x18] sm:$0xff]  ;;  %v90_v57 = vld [vmem:[#allocation2 + $0x28] sm:$0xff] }
  0x27   :  { %473 = vmatpush.msra.mxu3 %v107_v26  ;;  %206 = vmatpush.msra.mxu1 %v819_v28  ;;  %v182_v49 = vld [vmem:[#allocation7] sm:$0xff]  ;;  %v91_v58 = vld [vmem:[#allocation2 + $0x30] sm:$0xff]  ;;  %v92_v59 = vld [vmem:[#allocation2 + $0x38] sm:$0xff] }
  0x28   :  { %288 = vmatpush.msra.mxu2 %v816_v27  ;;  %126 = vmatpush.msra.mxu0 %v107_v26  ;;  %v89_v56 = vld [vmem:[#allocation2 + $0x20] sm:$0xff]  ;;  %v94_v61 = vld [vmem:[#allocation2 + $0x48] sm:$0xff]  ;;  %v95_v62 = vld [vmem:[#allocation2 + $0x50] sm:$0xff] }
  0x29   :  { %474 = vmatpush.msra.mxu3 %v106_v29  ;;  %207 = vmatpush.msra.mxu1 %v825_v31  ;;  %v93_v60 = vld [vmem:[#allocation2 + $0x40] sm:$0xff]  ;;  %v96_v63 = vld [vmem:[#allocation2 + $0x58] sm:$0xff] }
  0x2a   :  { %289 = vmatpush.msra.mxu2 %v822_v30  ;;  %127 = vmatpush.msra.mxu0 %v106_v29 }
  0x2b   :  { %475 = vmatpush.msra.mxu3 %v105_v32  ;;  %208 = vmatpush.msra.mxu1 %v831_v34 }
  0x2c   :  { %290 = vmatpush.msra.mxu2 %v828_v33  ;;  %128 = vmatpush.msra.mxu0 %v105_v32 }
  0x2d   :  { %476 = vmatpush.msra.mxu3 %v104_v35  ;;  %209 = vmatpush.msra.mxu1 %v186_v37 }
  0x2e   :  { %291 = vmatpush.msra.mxu2 %v834_v36  ;;  %129 = vmatpush.msra.mxu0 %v104_v35 }
  0x2f   :  { %477 = vmatpush.msra.mxu3 %v103_v38  ;;  %210 = vmatpush.msra.mxu1 %v185_v40 }
  0x30   :  { %292 = vmatpush.msra.mxu2 %v838_v39  ;;  %130 = vmatpush.msra.mxu0 %v103_v38 }
  0x31   :  { %478 = vmatpush.msra.mxu3 %v102_v41  ;;  %211 = vmatpush.msra.mxu1 %v184_v43 }
  0x32   :  { %293 = vmatpush.msra.mxu2 %v841_v42  ;;  %131 = vmatpush.msra.mxu0 %v102_v41 }
  0x33   :  { %479 = vmatpush.msra.mxu3 %v101_v44  ;;  %212 = vmatpush.msra.mxu1 %v183_v48 }
  0x34   :  { %294 = vmatpush.msra.mxu2 %v844_v45  ;;  %169 = vmatmul.f32.vlgmr.msra.gmra.mxu3 %v847_v46 }
  0x35   :  { %295 = vmatmul.f32.vlgmr.msra.gmra.mxu2 %v85_v47  ;;  %480 = vmatpush.msrb.mxu3 %v774_v6 }
  0x36   :  { %132 = vmatpush.msra.mxu0 %v101_v44  ;;  %213 = vmatpush.msra.mxu1 %v182_v49 }
  0x37   :  { %481 = vmatpush.msrb.mxu3 %v777_v7  ;;  %133 = vmatmul.f32.vlgmr.msra.gmra.mxu0 %v85_v47 }
  0x38   :  { %214 = vmatmul.f32.vlgmr.msra.gmra.mxu1 %v85_v47 }
  0x39   :  { %482 = vmatpush.msrb.mxu3 %v783_v10 }
  0x3b   :  { %483 = vmatpush.msrb.mxu3 %v789_v13 }
  0x3c   :  { %172 = vmatmul.f32.gmra.mxu3 %v854_v50 }
  0x3d   :  { %298 = vmatmul.f32.gmra.mxu2 %v86_v51  ;;  %484 = vmatpush.msrb.mxu3 %v795_v16 }
  0x3f   :  { %485 = vmatpush.msrb.mxu3 %v801_v19  ;;  %136 = vmatmul.f32.gmra.mxu0 %v86_v51 }
  0x40   :  { %217 = vmatmul.f32.gmra.mxu1 %v86_v51 }
  0x41   :  { %486 = vmatpush.msrb.mxu3 %v807_v22 }
  0x43   :  { %487 = vmatpush.msrb.mxu3 %v813_v25 }
  0x44   :  { %175 = vmatmul.f32.gmra.mxu3 %v861_v52 }
  0x45   :  { %301 = vmatmul.f32.gmra.mxu2 %v87_v53  ;;  %488 = vmatpush.msrb.mxu3 %v819_v28 }
  0x47   :  { %489 = vmatpush.msrb.mxu3 %v825_v31  ;;  %139 = vmatmul.f32.gmra.mxu0 %v87_v53 }
  0x48   :  { %220 = vmatmul.f32.gmra.mxu1 %v87_v53 }
  0x49   :  { %490 = vmatpush.msrb.mxu3 %v831_v34 }
  0x4b   :  { %491 = vmatpush.msrb.mxu3 %v186_v37 }
  0x4c   :  { %178 = vmatmul.f32.gmra.mxu3 %v868_v54 }
  0x4d   :  { %304 = vmatmul.f32.gmra.mxu2 %v88_v55  ;;  %492 = vmatpush.msrb.mxu3 %v185_v40 }
  0x4f   :  { %493 = vmatpush.msrb.mxu3 %v184_v43  ;;  %142 = vmatmul.f32.gmra.mxu0 %v88_v55 }
  0x50   :  { %223 = vmatmul.f32.gmra.mxu1 %v88_v55 }
  0x51   :  { %494 = vmatpush.msrb.mxu3 %v183_v48 }
  0x53   :  { %495 = vmatpush.msrb.mxu3 %v182_v49 }
  0x54   :  { %250 = vmatmul.f32.vlgmr.msrb.gmra.mxu3 %v847_v46 }
  0x55   :  { %307 = vmatmul.f32.gmra.mxu2 %v89_v56  ;;  %496 = vmatpush.msra.mxu3 %v767_v1 }
  0x57   :  { %497 = vmatpush.msra.mxu3 %v770_v3  ;;  %145 = vmatmul.f32.gmra.mxu0 %v89_v56 }
  0x58   :  { %226 = vmatmul.f32.gmra.mxu1 %v89_v56 }
  0x59   :  { %498 = vmatpush.msra.mxu3 %v772_v5 }
  0x5b   :  { %499 = vmatpush.msra.mxu3 %v780_v9 }
  0x5c   :  { %253 = vmatmul.f32.gmra.mxu3 %v854_v50 }
  0x5d   :  { %310 = vmatmul.f32.gmra.mxu2 %v90_v57  ;;  %500 = vmatpush.msra.mxu3 %v786_v12 }
  0x5f   :  { %501 = vmatpush.msra.mxu3 %v792_v15  ;;  %148 = vmatmul.f32.gmra.mxu0 %v90_v57 }
  0x60   :  { %229 = vmatmul.f32.gmra.mxu1 %v90_v57 }
  0x61   :  { %502 = vmatpush.msra.mxu3 %v798_v18 }
  0x63   :  { %503 = vmatpush.msra.mxu3 %v804_v21 }
  0x64   :  { %256 = vmatmul.f32.gmra.mxu3 %v861_v52 }
  0x65   :  { %313 = vmatmul.f32.gmra.mxu2 %v91_v58  ;;  %504 = vmatpush.msra.mxu3 %v810_v24 }
  0x67   :  { %505 = vmatpush.msra.mxu3 %v816_v27  ;;  %151 = vmatmul.f32.gmra.mxu0 %v91_v58 }
  0x68   :  { %232 = vmatmul.f32.gmra.mxu1 %v91_v58 }
  0x69   :  { %506 = vmatpush.msra.mxu3 %v822_v30 }
  0x6b   :  { %507 = vmatpush.msra.mxu3 %v828_v33 }
  0x6c   :  { %259 = vmatmul.f32.gmra.mxu3 %v868_v54 }
  0x6d   :  { %316 = vmatmul.f32.gmra.mxu2 %v92_v59  ;;  %508 = vmatpush.msra.mxu3 %v834_v36 }
  0x6f   :  { %509 = vmatpush.msra.mxu3 %v838_v39  ;;  %154 = vmatmul.f32.gmra.mxu0 %v92_v59 }
  0x70   :  { %235 = vmatmul.f32.gmra.mxu1 %v92_v59 }
  0x71   :  { %510 = vmatpush.msra.mxu3 %v841_v42 }
  0x73   :  { %511 = vmatpush.msra.mxu3 %v844_v45 }
  0x74   :  { %331 = vmatmul.f32.vlgmr.msra.gmra.mxu3 %v847_v46 }
  0x75   :  { %319 = vmatmul.f32.gmra.mxu2 %v93_v60 }
  0x77   :  { %157 = vmatmul.f32.gmra.mxu0 %v93_v60 }
  0x78   :  { %238 = vmatmul.f32.gmra.mxu1 %v93_v60 }
  0x7c   :  { %334 = vmatmul.f32.gmra.mxu3 %v854_v50 }
  0x7d   :  { %322 = vmatmul.f32.gmra.mxu2 %v94_v61 }
  0x7f   :  { %160 = vmatmul.f32.gmra.mxu0 %v94_v61 }
  0x80   :  { %241 = vmatmul.f32.gmra.mxu1 %v94_v61 }
  0x84   :  { %337 = vmatmul.f32.gmra.mxu3 %v861_v52 }
  0x85   :  { %325 = vmatmul.f32.gmra.mxu2 %v95_v62 }
  0x87   :  { %163 = vmatmul.f32.gmra.mxu0 %v95_v62 }
  0x88   :  { %244 = vmatmul.f32.gmra.mxu1 %v95_v62 }
  0x8c   :  { %340 = vmatmul.f32.gmra.mxu3 %v868_v54 }
  0x8d   :  { %328 = vmatmul.f32.gmra.mxu2 %v96_v63 }
  0x8f   :  { %166 = vmatmul.f32.gmra.mxu0 %v96_v63 }
  0x90   :  { %247 = vmatmul.f32.gmra.mxu1 %v96_v63 }
  0xb4   :  { %v134_v0 = vpop.f32.mrf.mxu0 }
  0xb5   :  { %v344_v1 = vmul.f32 0.25, %v134_v0  ;;  %v215_v2 = vpop.f32.mrf.mxu1 }
  0xb6   :  { %376 = vst [vmem:[#allocation11] sm:$0xff] %v215_v2 }
  0xb7   :  { %360 = vst [vmem:[#allocation10] sm:$0xff] %v344_v1  ;;  %v170_v3 = vpop.f32.mrf.mxu3 }
  0xb8   :  { %v296_v4 = vpop.f32.mrf.mxu2  ;;  %v356_v5 = vmul.f32 0.25, %v170_v3 }
  0xb9   :  { %392 = vst [vmem:[#allocation13] sm:$0xff] %v296_v4 }
  0xba   :  { %372 = vst [vmem:[#allocation10 + $0x60] sm:$0xff] %v356_v5 }
  0xbc   :  { %v137_v6 = vpop.f32.mrf.mxu0 }
  0xbd   :  { %v345_v7 = vmul.f32 0.25, %v137_v6  ;;  %v218_v8 = vpop.f32.mrf.mxu1 }
  0xbe   :  { %377 = vst [vmem:[#allocation11 + $0x8] sm:$0xff] %v218_v8 }
  0xbf   :  { %361 = vst [vmem:[#allocation10 + $0x8] sm:$0xff] %v345_v7  ;;  %v173_v9 = vpop.f32.mrf.mxu3 }
  0xc0   :  { %v299_v10 = vpop.f32.mrf.mxu2  ;;  %v357_v11 = vmul.f32 0.25, %v173_v9 }
  0xc1   :  { %393 = vst [vmem:[#allocation13 + $0x8] sm:$0xff] %v299_v10 }
  0xc2   :  { %373 = vst [vmem:[#allocation10 + $0x68] sm:$0xff] %v357_v11 }
  0xc4   :  { %v140_v12 = vpop.f32.mrf.mxu0 }
  0xc5   :  { %v346_v13 = vmul.f32 0.25, %v140_v12  ;;  %v221_v14 = vpop.f32.mrf.mxu1 }
  0xc6   :  { %378 = vst [vmem:[#allocation11 + $0x10] sm:$0xff] %v221_v14 }
  0xc7   :  { %362 = vst [vmem:[#allocation10 + $0x10] sm:$0xff] %v346_v13  ;;  %v176_v15 = vpop.f32.mrf.mxu3 }
  0xc8   :  { %v302_v16 = vpop.f32.mrf.mxu2  ;;  %v358_v17 = vmul.f32 0.25, %v176_v15 }
  0xc9   :  { %394 = vst [vmem:[#allocation13 + $0x10] sm:$0xff] %v302_v16 }
  0xca   :  { %374 = vst [vmem:[#allocation10 + $0x70] sm:$0xff] %v358_v17 }
  0xcc   :  { %v143_v18 = vpop.f32.mrf.mxu0 }
  0xcd   :  { %v347_v19 = vmul.f32 0.25, %v143_v18  ;;  %v224_v20 = vpop.f32.mrf.mxu1 }
  0xce   :  { %379 = vst [vmem:[#allocation11 + $0x18] sm:$0xff] %v224_v20 }
  0xcf   :  { %363 = vst [vmem:[#allocation10 + $0x18] sm:$0xff] %v347_v19  ;;  %v179_v21 = vpop.f32.mrf.mxu3 }
  0xd0   :  { %v305_v22 = vpop.f32.mrf.mxu2  ;;  %v359_v23 = vmul.f32 0.25, %v179_v21 }
  0xd1   :  { %395 = vst [vmem:[#allocation13 + $0x18] sm:$0xff] %v305_v22 }
  0xd2   :  { %375 = vst [vmem:[#allocation10 + $0x78] sm:$0xff] %v359_v23 }
  0xd4   :  { %v146_v24 = vpop.f32.mrf.mxu0 }
  0xd5   :  { %v348_v25 = vmul.f32 0.25, %v146_v24  ;;  %v227_v26 = vpop.f32.mrf.mxu1 }
  0xd6   :  { %380 = vst [vmem:[#allocation11 + $0x20] sm:$0xff] %v227_v26 }
  0xd7   :  { %364 = vst [vmem:[#allocation10 + $0x20] sm:$0xff] %v348_v25  ;;  %v251_v27 = vpop.f32.mrf.mxu3 }
  0xd8   :  { %v308_v28 = vpop.f32.mrf.mxu2  ;;  %388 = vst [vmem:[#allocation11 + $0x60] sm:$0xff] %v251_v27 }
  0xd9   :  { %396 = vst [vmem:[#allocation13 + $0x20] sm:$0xff] %v308_v28 }
  0xdc   :  { %v149_v29 = vpop.f32.mrf.mxu0 }
  0xdd   :  { %v349_v30 = vmul.f32 0.25, %v149_v29  ;;  %v230_v31 = vpop.f32.mrf.mxu1 }
  0xde   :  { %381 = vst [vmem:[#allocation11 + $0x28] sm:$0xff] %v230_v31 }
  0xdf   :  { %365 = vst [vmem:[#allocation10 + $0x28] sm:$0xff] %v349_v30  ;;  %v254_v32 = vpop.f32.mrf.mxu3 }
  0xe0   :  { %v311_v33 = vpop.f32.mrf.mxu2  ;;  %389 = vst [vmem:[#allocation11 + $0x68] sm:$0xff] %v254_v32 }
  0xe1   :  { %397 = vst [vmem:[#allocation13 + $0x28] sm:$0xff] %v311_v33 }
  0xe4   :  { %v152_v34 = vpop.f32.mrf.mxu0 }
  0xe5   :  { %v350_v35 = vmul.f32 0.25, %v152_v34  ;;  %v233_v36 = vpop.f32.mrf.mxu1 }
  0xe6   :  { %382 = vst [vmem:[#allocation11 + $0x30] sm:$0xff] %v233_v36 }
  0xe7   :  { %366 = vst [vmem:[#allocation10 + $0x30] sm:$0xff] %v350_v35  ;;  %v257_v37 = vpop.f32.mrf.mxu3 }
  0xe8   :  { %v314_v38 = vpop.f32.mrf.mxu2  ;;  %390 = vst [vmem:[#allocation11 + $0x70] sm:$0xff] %v257_v37 }
  0xe9   :  { %398 = vst [vmem:[#allocation13 + $0x30] sm:$0xff] %v314_v38 }
  0xec   :  { %v155_v39 = vpop.f32.mrf.mxu0 }
  0xed   :  { %v351_v40 = vmul.f32 0.25, %v155_v39  ;;  %v236_v41 = vpop.f32.mrf.mxu1 }
  0xee   :  { %383 = vst [vmem:[#allocation11 + $0x38] sm:$0xff] %v236_v41 }
  0xef   :  { %367 = vst [vmem:[#allocation10 + $0x38] sm:$0xff] %v351_v40  ;;  %v260_v42 = vpop.f32.mrf.mxu3 }
  0xf0   :  { %v317_v43 = vpop.f32.mrf.mxu2  ;;  %391 = vst [vmem:[#allocation11 + $0x78] sm:$0xff] %v260_v42 }
  0xf1   :  { %399 = vst [vmem:[#allocation13 + $0x38] sm:$0xff] %v317_v43 }
  0xf4   :  { %v158_v44 = vpop.f32.mrf.mxu0 }
  0xf5   :  { %v352_v45 = vmul.f32 0.25, %v158_v44  ;;  %v239_v46 = vpop.f32.mrf.mxu1 }
  0xf6   :  { %384 = vst [vmem:[#allocation11 + $0x40] sm:$0xff] %v239_v46 }
  0xf7   :  { %368 = vst [vmem:[#allocation10 + $0x40] sm:$0xff] %v352_v45  ;;  %v332_v48 = vpop.f32.mrf.mxu3 }
  0xf8   :  { %v320_v47 = vpop.f32.mrf.mxu2  ;;  %404 = vst [vmem:[#allocation13 + $0x60] sm:$0xff] %v332_v48 }
  0xf9   :  { %400 = vst [vmem:[#allocation13 + $0x40] sm:$0xff] %v320_v47 }
  0xfc   :  { %v161_v49 = vpop.f32.mrf.mxu0 }
  0xfd   :  { %v353_v50 = vmul.f32 0.25, %v161_v49  ;;  %v242_v51 = vpop.f32.mrf.mxu1 }
  0xfe   :  { %385 = vst [vmem:[#allocation11 + $0x48] sm:$0xff] %v242_v51 }
  0xff   :  { %369 = vst [vmem:[#allocation10 + $0x48] sm:$0xff] %v353_v50  ;;  %v335_v53 = vpop.f32.mrf.mxu3 }
 0x100   :  { %v323_v52 = vpop.f32.mrf.mxu2  ;;  %405 = vst [vmem:[#allocation13 + $0x68] sm:$0xff] %v335_v53 }
 0x101   :  { %401 = vst [vmem:[#allocation13 + $0x48] sm:$0xff] %v323_v52 }
 0x104   :  { %v164_v54 = vpop.f32.mrf.mxu0 }
 0x105   :  { %v354_v55 = vmul.f32 0.25, %v164_v54  ;;  %v245_v56 = vpop.f32.mrf.mxu1 }
 0x106   :  { %386 = vst [vmem:[#allocation11 + $0x50] sm:$0xff] %v245_v56 }
 0x107   :  { %370 = vst [vmem:[#allocation10 + $0x50] sm:$0xff] %v354_v55  ;;  %v338_v58 = vpop.f32.mrf.mxu3 }
 0x108   :  { %v326_v57 = vpop.f32.mrf.mxu2  ;;  %406 = vst [vmem:[#allocation13 + $0x70] sm:$0xff] %v338_v58 }
 0x109   :  { %402 = vst [vmem:[#allocation13 + $0x50] sm:$0xff] %v326_v57 }
 0x10c   :  { %v167_v59 = vpop.f32.mrf.mxu0 }
 0x10d   :  { %v355_v60 = vmul.f32 0.25, %v167_v59  ;;  %v248_v61 = vpop.f32.mrf.mxu1 }
 0x10e   :  { %387 = vst [vmem:[#allocation11 + $0x58] sm:$0xff] %v248_v61 }
 0x10f   :  { %371 = vst [vmem:[#allocation10 + $0x58] sm:$0xff] %v355_v60  ;;  %v341_v63 = vpop.f32.mrf.mxu3  ;;  %433 = dma.vmem_to_hbm [thread:$0]  %s426_s21, 2048, %s428_s24, [#allocation12], %s700_s29, %s700_s29, %s701_s30  }
 0x110   :  { %v329_v62 = vpop.f32.mrf.mxu2  ;;  %420 = dma.vmem_to_hbm [thread:$0]  %s413_s16, 2048, %s415_s19, [#allocation4], %s700_s29, %s700_s29, %s701_s30   ;;  %407 = vst [vmem:[#allocation13 + $0x78] sm:$0xff] %v341_v63 }
 0x111   :  { %403 = vst [vmem:[#allocation13 + $0x58] sm:$0xff] %v329_v62 }
 0x112   :  { %446 = dma.vmem_to_hbm [thread:$0]  %s439_s26, 2048, %s441_s7, [#allocation12], %s700_s29, %s700_s29, %s701_s30  }
 0x113   :  { %695 = dma.done.wait [#allocation4], 2048  }
 0x114   :  { %696 = vsyncadd [#allocation4], 4294965248 }
 0x115   :  { %697 = dma.done.wait [#allocation12], 4096  }
 0x116   :  { %698 = vsyncadd [#allocation12], 4294963200 }
 0x117   :  { %459 = vsyncpa [#allocation3], 1 }
 0x118   :  { %460 = vsyncpa [#allocation6], 1 }
 0x119   :  { %461 = vsyncpa [#allocation9], 1 }
 0x11a   :  { %462 = vsyncpa [#allocation4], 1 }
 0x11b   :  { %463 = vsyncpa [#allocation12], 1 }

</bundles_post_ra>
